<compile_context>
chip_gen: v5e
topology: v5e:2x2
jax: 0.10.0
libtpu: 0.0.40
codegen_flags: <defaults>
</compile_context>

<pallas_src>
import math

import jax
import jax.numpy as jnp
from jax.experimental import pallas as pl
from jax.experimental.pallas import tpu as pltpu

LANE = 128                   # TPU lane width (last dim of every block)
TARGET_TILE_BYTES = 2 << 20  # ~2 MiB per input buffer per pipeline slot


def _cdiv(a, b):
    return (a + b - 1) // b


def _round_up(a, b):
    return _cdiv(a, b) * b


def _sublane(dtype):
    # sublane packing factor: 8 rows for 4-byte, 16 for 2-byte, 32 for 1-byte
    return {4: 8, 2: 16, 1: 32}.get(jnp.dtype(dtype).itemsize, 8)


def _pick_row_tile(rows, sublane, cap_rows):
    """Row tile: multiple of the dtype's sublane packing, <= cap, and small
    enough that the grid keeps >= 2 steps (v7x megacore) when rows allow."""
    if rows <= sublane:
        return rows                              # block == full dim (legal)
    cap = max(sublane, (cap_rows // sublane) * sublane)
    half = _round_up(_cdiv(rows, 2), sublane)    # prefer >= 2 grid steps
    return max(sublane, min(cap, half, _round_up(rows, sublane)))


def _pick_lane_tile(s, max_elems):
    """Largest multiple-of-128 divisor of s that fits the per-tile budget."""
    k = max(1, min(s, max_elems) // LANE)
    while k > 1 and s % (k * LANE) != 0:
        k -= 1
    return k * LANE


def _gate_split(x_shape, y_shape):
    """Detect the classic SqEx gate pattern: y broadcastable to x and constant
    over x's trailing dims.  Returns (R, S, n_trailing_ones) or None."""
    nd = len(x_shape)
    if len(y_shape) > nd:
        return None
    ys = (1,) * (nd - len(y_shape)) + tuple(y_shape)
    if ys == tuple(x_shape):
        return None                              # full elementwise y
    for a, b in zip(x_shape, ys):
        if b != 1 and b != a:
            return None                          # not broadcastable
    t = 0
    for d in reversed(ys):
        if d != 1:
            break
        t += 1
    if t == 0:
        return None                              # y varies along the last dim
    r = math.prod(x_shape[: nd - t]) if nd - t > 0 else 1
    s = math.prod(x_shape[nd - t:])
    return r, s, t


# --------------------------- kernel bodies ---------------------------------

def _mul_kernel(x_ref, y_ref, o_ref):
    # out = x * y.  y is either a full tile (general path, no residual) or a
    # [rows, 1] gate that broadcasts across lanes (gate path, residual folded).
    o_ref[...] = x_ref[...] * y_ref[...]


def _mul_add_kernel(x_ref, y_ref, o_ref):
    # out = x * y + x  (general path with residual; 2 VPU ops, still HBM-bound)
    x = x_ref[...]
    o_ref[...] = x * y_ref[...] + x


# ----------------------------- wrappers -------------------------------------

def _sqex_gate(x, y, r, s, t, with_residual):
    """Per-channel-gate path: never materialises broadcast(y)."""
    nd = x.ndim
    dtype = x.dtype
    itemsize = jnp.dtype(dtype).itemsize
    sublane = _sublane(dtype)
    target_elems = TARGET_TILE_BYTES // itemsize

    x2 = x.reshape(r, s)
    # Tiny per-row gate.  Residual folded in:  x*y + x == x*(1 + y).
    yg = jnp.broadcast_to(y, x.shape[: nd - t] + (1,) * t).reshape(r, 1)
    yg = yg.astype(dtype)
    if with_residual:
        yg = yg + jnp.ones((), dtype)

    ts = _pick_lane_tile(s, target_elems)
    tr = _pick_row_tile(r, sublane, max(sublane, target_elems // ts))
    grid = (_cdiv(r, tr), _cdiv(s, ts))

    out2 = pl.pallas_call(
        _mul_kernel,
        out_shape=jax.ShapeDtypeStruct((r, s), dtype),
        grid_spec=pltpu.PrefetchScalarGridSpec(
            num_scalar_prefetch=0,
            grid=grid,
            in_specs=[
                pl.BlockSpec((tr, ts), lambda i, j: (i, j)),
                pl.BlockSpec((tr, 1), lambda i, j: (i, 0)),
            ],
            out_specs=pl.BlockSpec((tr, ts), lambda i, j: (i, j)),
        ),
        compiler_params=pltpu.CompilerParams(
            dimension_semantics=("parallel", "parallel")),
    )(x2, yg)
    return out2.reshape(x.shape)


def _sqex_general(x, y, with_residual):
    """Full-elementwise path: x and y streamed as lane-dense [M, 128] slabs."""
    dtype = x.dtype
    if y.shape != x.shape:
        # Irregular broadcast pattern (y varies along trailing dims).  The
        # classic SqEx gate never reaches this branch.
        y = jnp.broadcast_to(y, x.shape)
    y = y.astype(dtype)

    orig_shape = x.shape
    n = x.size
    itemsize = jnp.dtype(dtype).itemsize
    sublane = _sublane(dtype)

    xf = x.reshape(-1)
    yf = y.reshape(-1)
    padded = (n % LANE) != 0
    if padded:
        # TODO(synk): rare slow path (extra pad/slice HBM passes) when the
        # element count is not a multiple of 128.
        n_pad = _round_up(max(n, LANE), LANE)
        xf = jnp.pad(xf, (0, n_pad - n))
        yf = jnp.pad(yf, (0, n_pad - n))
    m = xf.size // LANE
    x2 = xf.reshape(m, LANE)
    y2 = yf.reshape(m, LANE)

    cap_rows = max(sublane, (TARGET_TILE_BYTES // itemsize) // LANE)
    tm = _pick_row_tile(m, sublane, cap_rows)
    grid = (_cdiv(m, tm),)

    kernel = _mul_add_kernel if with_residual else _mul_kernel

    out2 = pl.pallas_call(
        kernel,
        out_shape=jax.ShapeDtypeStruct((m, LANE), dtype),
        grid_spec=pltpu.PrefetchScalarGridSpec(
            num_scalar_prefetch=0,
            grid=grid,
            in_specs=[
                pl.BlockSpec((tm, LANE), lambda i: (i, 0)),
                pl.BlockSpec((tm, LANE), lambda i: (i, 0)),
            ],
            out_specs=pl.BlockSpec((tm, LANE), lambda i: (i, 0)),
        ),
        compiler_params=pltpu.CompilerParams(
            dimension_semantics=("parallel",)),
    )(x2, y2)

    if padded:
        return out2.reshape(-1)[:n].reshape(orig_shape)
    return out2.reshape(orig_shape)


def sqex_forward(x, y, with_residual=True):
    """texture = x * y (+ x if with_residual), matching SqEx.forward."""
    gate = _gate_split(x.shape, y.shape)
    if gate is not None:
        r, s, t = gate
        if s % LANE == 0 and r >= _sublane(x.dtype):
            return _sqex_gate(x, y, r, s, t, with_residual)
    return _sqex_general(x, y, with_residual)


if __name__ == "__main__":
    sqex = jax.jit(sqex_forward, static_argnames=("with_residual",))

    key = jax.random.PRNGKey(0)
    kx, ky, kg = jax.random.split(key, 3)

    B, C, H, W = 2, 4, 16, 16
    x = jax.random.normal(kx, (B, C, H, W), dtype=jnp.float32)
    y_full = jax.random.normal(ky, (B, C, H, W), dtype=jnp.float32)
    y_gate = jax.random.normal(kg, (B, C, 1, 1), dtype=jnp.float32)

    # Full elementwise y, with residual.
    out = sqex(x, y_full, with_residual=True)
    jax.block_until_ready(out)
    assert out.shape == x.shape
    assert jnp.allclose(out, x * y_full + x, atol=1e-5, rtol=1e-5)

    # Full elementwise y, no residual.
    out_nr = sqex(x, y_full, with_residual=False)
    jax.block_until_ready(out_nr)
    assert jnp.allclose(out_nr, x * y_full, atol=1e-5, rtol=1e-5)

    # Classic SqEx per-channel gate [B,C,1,1]: broadcast never materialised.
    out_g = sqex(x, y_gate, with_residual=True)
    jax.block_until_ready(out_g)
    assert out_g.shape == x.shape
    assert jnp.allclose(out_g, x * y_gate + x, atol=1e-5, rtol=1e-5)

    print("KERNEL_OK")
</pallas_src>

<mosaic_0001>
module attributes {stable_mosaic.version = 11 : i64} {
  func.func @_mul_add_kernel(%arg0: i32, %arg1: memref<8x128xf32, #tpu.memory_space<vmem>>, %arg2: memref<8x128xf32, #tpu.memory_space<vmem>>, %arg3: memref<8x128xf32, #tpu.memory_space<vmem>>) attributes {dimension_semantics = [#tpu.dimension_semantics<parallel>], iteration_bounds = array<i64: 2>, scalar_prefetch = 0 : i64, scratch_operands = 0 : i64, tpu.core_type = #tpu.core_type<tc>, window_params = [{transform_indices = @transform_0, window_bounds = array<i64: 8, 128>}, {transform_indices = @transform_1, window_bounds = array<i64: 8, 128>}, {transform_indices = @transform_2, window_bounds = array<i64: 8, 128>}]} {
    %c0 = arith.constant 0 : index
    %c0_0 = arith.constant 0 : index
    %0 = vector.load %arg1[%c0, %c0_0] : memref<8x128xf32, #tpu.memory_space<vmem>>, vector<8x128xf32>
    %c0_1 = arith.constant 0 : index
    %c0_2 = arith.constant 0 : index
    %1 = vector.load %arg2[%c0_1, %c0_2] : memref<8x128xf32, #tpu.memory_space<vmem>>, vector<8x128xf32>
    %2 = arith.mulf %0, %1 : vector<8x128xf32>
    %3 = arith.addf %2, %0 : vector<8x128xf32>
    %c0_3 = arith.constant 0 : index
    %c0_4 = arith.constant 0 : index
    %4 = vector.load %arg3[%c0_3, %c0_4] : memref<8x128xf32, #tpu.memory_space<vmem>>, vector<8x128xf32>
    tpu.vector_store %arg3[%c0_3, %c0_4], %3 {strides = array<i32>} : memref<8x128xf32, #tpu.memory_space<vmem>>, vector<8x128xf32>,
    return
  }
  func.func @transform_0(%arg0: i32) -> (i32, i32) {
    %c0_i32 = arith.constant 0 : i32
    %c0_i32_0 = arith.constant 0 : i32
    return %arg0, %c0_i32 : i32, i32
  }
  func.func @transform_1(%arg0: i32) -> (i32, i32) {
    %c0_i32 = arith.constant 0 : i32
    %c0_i32_0 = arith.constant 0 : i32
    return %arg0, %c0_i32 : i32, i32
  }
  func.func @transform_2(%arg0: i32) -> (i32, i32) {
    %c0_i32 = arith.constant 0 : i32
    %c0_i32_0 = arith.constant 0 : i32
    return %arg0, %c0_i32 : i32, i32
  }
}

</mosaic_0001>

<bundles_post_ra>
// kernel: sqex_forward.1
= control target key start
LH: loop header
LB: loop body
LE: loop exit
PB: predicated region body
PF: predicated region fallthrough
CT: control target
= control target key end

     0   :  { %s248_s9 = smov 0   ;;  %s276_s0 = inlined_call_operand.vmem [shape: f32[16,128], index: 0, kind: input, shape index: {}]   ;;  %s277_s1 = inlined_call_operand.vmem [shape: f32[16,128], index: 1, kind: input, shape index: {}]   ;;  %s278_s2 = inlined_call_operand.vmem [shape: f32[16,128], index: 2, kind: output, shape index: {}]  }
   0x1 LB: > { %s226_s10 = sadd.s32 4294967295, %s250_s9   ;;  %p230_p0 = scmp.ge.s32.totalorder %s250_s9, 1  ;;  %s250_s9 = sphi %s248_s9, %s12_s9  }
   0x2   : > { %p120_p1 = scmp.lt.s32.totalorder %s250_s9, 3 }
   0x4   : > { %p121_p2 = pnand %p230_p0, %p120_p1 }
   0x5   : > { %p144_p3 = scmp.lt.s32.totalorder (!%p121_p2), %s226_s10, 1 }
   0x6   : > { %124 = sbr.rel (%p121_p2) target bundleno = 21 (0x15), region = 28 }
   0xb   : > { %s280_s10 = smov (!%p144_p3, %s226_s10), 1 }
   0xc   : > { %s231_s11 = sshll.u32 %s280_s10, 3 }
   0xd   : > { %s147_s14 = scalar_lea.vmem %s276_s0, %s231_s11  ;;  %s151_s17 = scalar_lea.vmem %s277_s1, %s231_s11 }
   0xe   : > { %v156_v0 = vld [vmem:[%s147_s14] sm:$0xff]  ;;  %s155_s20 = scalar_lea.vmem %s278_s2, %s231_s11 }
   0xf   : > { %v157_v1 = vld [vmem:[%s151_s17] sm:$0xff] }
  0x10   : > { %v158_v2 = vmul.f32 %v157_v1, %v156_v0 }
  0x12   : > { %v159_v3 = vadd.f32 %v158_v2, %v156_v0 }
  0x14   : > { %160 = vst [vmem:[%s155_s20] sm:$0xff] %v159_v3 }
  0x15 PF: > { %s12_s9 = sadd.s32 1, %s250_s9  }
  0x16   : > { %p9_p4 = scmp.ge.s32.totalorder %s12_s9, 4  }
  0x18   :  { %11 = sbr.rel (!%p9_p4) target bundleno = 1 (0x1), region = 61 }

</bundles_post_ra>
